<compile_context>
chip_gen: v5e
topology: v5e:2x2
jax: 0.10.0
libtpu: 0.0.40
codegen_flags: <defaults>
</compile_context>

<pallas_src>
import functools

import jax
import jax.numpy as jnp
from jax.experimental import pallas as pl
from jax.experimental.pallas import tpu as pltpu

EPS = 1e-12  # matches torch.nn.functional.normalize default eps


def _normalize_rows(x):
    """L2-normalize rows; multiply-by-rsqrt (EUP slot) instead of divide (VALU)."""
    x = x.astype(jnp.float32)
    return x * jax.lax.rsqrt(
        jnp.maximum(jnp.sum(x * x, axis=1, keepdims=True), EPS * EPS))


# ----------------------------------------------------------------------------
# Fused e-layer kernels: normalize(q) -> cos-sim (MXU) -> top-1 one-hot ->
# one-hot @ p_flat (exact gather on the MXU) -> lane-dense (B, L*D) output.
# ----------------------------------------------------------------------------
def _topk1_onehot(sim):
    """Top-1 one-hot per row (first max index on exact ties; ties may differ
    from torch.topk — documented, acceptable)."""
    pool = sim.shape[1]
    col = jax.lax.broadcasted_iota(jnp.int32, sim.shape, 1)
    mx = jnp.max(sim, axis=1, keepdims=True)
    idx = jnp.min(jnp.where(sim >= mx, col, pool), axis=1, keepdims=True)
    return col == idx  # bool (TB, P)


def _e_select_kernel(q_ref, kn_ref, p_ref, out_ref):
    qn = _normalize_rows(q_ref[...])                              # (TB, D)
    kn = kn_ref[...].astype(jnp.float32)                          # (P, D)
    sim = jax.lax.dot_general(qn, kn, (((1,), (1,)), ((), ())),
                              preferred_element_type=jnp.float32)  # (TB, P)
    p = p_ref[...]                                                # (P, TLD)
    onehot = _topk1_onehot(sim).astype(p.dtype)                   # exact {0,1}
    gathered = jax.lax.dot_general(onehot, p, (((1,), (0,)), ((), ())),
                                   preferred_element_type=jnp.float32)
    out_ref[...] = gathered.astype(out_ref.dtype)


def _e_select_loss_kernel(q_ref, kn_ref, p_ref, out_ref, loss_ref,
                          colsum_ref, count_ref, *, true_batch):
    """Batch-tiled variant also emitting the torch broadcast-indexed loss
    (1 - cos_sim[:, k_idx]).sum() == B^2 - sum_p colsum[p]*count[p], using
    per-tile colsum/count accumulators (axis marked "arbitrary")."""
    step = pl.program_id(0)

    @pl.when(step == 0)
    def _():
        colsum_ref[...] = jnp.zeros_like(colsum_ref)
        count_ref[...] = jnp.zeros_like(count_ref)

    qn = _normalize_rows(q_ref[...])
    kn = kn_ref[...].astype(jnp.float32)
    sim = jax.lax.dot_general(qn, kn, (((1,), (1,)), ((), ())),
                              preferred_element_type=jnp.float32)
    onehot = _topk1_onehot(sim)
    onehot_f = onehot.astype(jnp.float32)

    # Mask padded (ragged last tile) rows out of the loss reduction; use
    # jnp.where (not multiply) so garbage/NaN from padded reads cannot leak in.
    tb = sim.shape[0]
    row = jax.lax.broadcasted_iota(jnp.int32, sim.shape, 0)
    valid = (row + step * tb) < true_batch
    colsum_ref[...] += jnp.sum(jnp.where(valid, sim, 0.0), axis=0, keepdims=True)
    count_ref[...] += jnp.sum(jnp.where(valid, onehot_f, 0.0), axis=0,
                              keepdims=True)

    p = p_ref[...]
    gathered = jax.lax.dot_general(onehot_f.astype(p.dtype), p,
                                   (((1,), (0,)), ((), ())),
                                   preferred_element_type=jnp.float32)
    out_ref[...] = gathered.astype(out_ref.dtype)

    @pl.when(step == pl.num_programs(0) - 1)
    def _():
        loss_ref[...] = (float(true_batch) ** 2
                         - jnp.sum(colsum_ref[...] * count_ref[...],
                                   keepdims=True))


# ----------------------------------------------------------------------------
# Tiling / VMEM helpers
# ----------------------------------------------------------------------------
def _round_up(x, m):
    return ((x + m - 1) // m) * m


def _pick_batch_tile(B):
    if B < 16:
        return B                         # tiny batch: single full block
    cap = 256 if B >= 512 else 128       # bigger tiles amortize step overhead (v6e)
    # cdiv(B, 2) guarantees >= 2 grid steps so v7x's 2nd TensorCore gets work
    return min(cap, _round_up(pl.cdiv(B, 2), 8))


def _pick_ld_tile(LD):
    """Column tile for the (B, L*D) output so each out block stays ~<=4K lanes
    and pipelines deeply; only clean 128-multiple divisors (no ragged lanes)."""
    if LD <= 4096:
        return LD
    for t in (4096, 3072, 2048, 1536, 1024):
        if LD % t == 0:
            return t
    return LD


def _vmem_estimate(TB, D, P, TLD, nld, q_dt, k_dt, p_dt, o_dt, with_loss):
    est = 2 * TB * D * jnp.dtype(q_dt).itemsize            # q, double-buffered
    est += P * D * jnp.dtype(k_dt).itemsize                # kn, single buffer
    est += (1 if nld == 1 else 2) * P * TLD * jnp.dtype(p_dt).itemsize
    est += 2 * TB * TLD * jnp.dtype(o_dt).itemsize         # out, double-buffered
    if with_loss:
        est += 3 * 8 * 128 * 4                             # padded scratch + loss
    return est


# ----------------------------------------------------------------------------
# e-prompt selection wrapper (single fused pallas_call)
# ----------------------------------------------------------------------------
def e_select(q, kn, p_flat, *, with_loss=False, out_dtype=None):
    B, D = q.shape
    P, LD = p_flat.shape
    out_dtype = p_flat.dtype if out_dtype is None else out_dtype

    TB = _pick_batch_tile(B)
    TLD = LD if with_loss else _pick_ld_tile(LD)
    nld = LD // TLD

    def est(tb):
        return _vmem_estimate(tb, D, P, TLD, nld, q.dtype, kn.dtype,
                              p_flat.dtype, out_dtype, with_loss)

    # Shrink the batch tile until the request fits v7x's tighter VMEM budget.
    while TB > 8 and TB % 8 == 0 and est(TB) > 18 * (1 << 20):
        TB = max(8, _round_up(TB // 2, 8))
    nb = pl.cdiv(B, TB)
    # Explicit scoped-VMEM limit (v5e default is only 16 MiB); stay well below
    # v7x's 64 MiB physical.
    vmem_limit = int(min(max(2 * est(TB) + (2 << 20), 32 << 20), 40 << 20))

    def spec(shape, index_map, single_buffer):
        if single_buffer:   # constant-index block: drop the dead 2nd buffer
            return pl.BlockSpec(shape, index_map, pipeline_mode=pl.Buffered(1))
        return pl.BlockSpec(shape, index_map)

    def build(single_buffer):
        if with_loss:
            return pl.pallas_call(
                functools.partial(_e_select_loss_kernel, true_batch=B),
                out_shape=(jax.ShapeDtypeStruct((B, LD), out_dtype),
                           jax.ShapeDtypeStruct((1, 1), jnp.float32)),
                grid=(nb,),
                in_specs=[
                    pl.BlockSpec((TB, D), lambda i: (i, 0)),
                    spec((P, D), lambda i: (0, 0), single_buffer),
                    spec((P, LD), lambda i: (0, 0), single_buffer),
                ],
                out_specs=(pl.BlockSpec((TB, LD), lambda i: (i, 0)),
                           pl.BlockSpec((1, 1), lambda i: (0, 0))),
                scratch_shapes=[pltpu.VMEM((1, P), jnp.float32),   # colsum
                                pltpu.VMEM((1, P), jnp.float32)],  # count
                compiler_params=pltpu.CompilerParams(
                    dimension_semantics=("arbitrary",),
                    vmem_limit_bytes=vmem_limit),
            )
        return pl.pallas_call(
            _e_select_kernel,
            out_shape=jax.ShapeDtypeStruct((B, LD), out_dtype),
            grid=(nb, nld),
            in_specs=[
                pl.BlockSpec((TB, D), lambda i, j: (i, 0)),
                spec((P, D), lambda i, j: (0, 0), single_buffer),
                spec((P, TLD), lambda i, j: (0, j), single_buffer and nld == 1),
            ],
            out_specs=pl.BlockSpec((TB, TLD), lambda i, j: (i, j)),
            compiler_params=pltpu.CompilerParams(
                dimension_semantics=("parallel", "parallel"),
                vmem_limit_bytes=vmem_limit),
        )

    try:
        res = build(True)(q, kn, p_flat)
    except Exception:  # pl.Buffered(1) unsupported -> default double-buffering
        res = build(False)(q, kn, p_flat)

    if with_loss:
        out, loss = res
        return out, loss[0, 0]
    return res


# ----------------------------------------------------------------------------
# DualPrompt module (JAX / Pallas)
# ----------------------------------------------------------------------------
class DualPromptPallas:
    def __init__(self, emb_d, n_tasks, prompt_param, key_dim=768, seed=0,
                 prompt_cache_dtype=None):
        self.task_count = 0
        self.emb_d = emb_d
        self.key_d = key_dim
        self.n_tasks = n_tasks
        self.prompt_cache_dtype = prompt_cache_dtype  # e.g. bf16 for bf16 ViTs
        # _init_smart
        self.top_k = 1
        self.task_id_bootstrap = True
        self.g_layers = [0, 1]
        self.e_layers = [2, 3, 4]
        self.g_p_length = int(prompt_param[2])
        self.e_p_length = int(prompt_param[1])
        self.e_pool_size = int(prompt_param[0])

        # deterministic uniform(0,1) init (tensor_prompt uses nn.init.uniform_)
        key = jax.random.PRNGKey(seed)
        self.params = {}
        for g in self.g_layers:
            key, sub = jax.random.split(key)
            self.params[f'g_p_{g}'] = jax.random.uniform(
                sub, (self.g_p_length, emb_d), jnp.float32)
        for e in self.e_layers:
            key, s1 = jax.random.split(key)
            key, s2 = jax.random.split(key)
            self.params[f'e_p_{e}'] = jax.random.uniform(
                s1, (self.e_pool_size, self.e_p_length, emb_d), jnp.float32)
            self.params[f'e_k_{e}'] = jax.random.uniform(
                s2, (self.e_pool_size, self.key_d), jnp.float32)
        self._refresh_param_caches()

    def _refresh_param_caches(self):
        """Keys are parameters, not activations: normalize once per parameter
        update; cache prompts pre-flattened to a lane-dense (pool, L*emb_d)
        layout (optionally bf16) so the gather output store is lane-dense."""
        self.norm_keys = {}
        self.p_flat = {}
        for e in self.e_layers:
            K = self.params[f'e_k_{e}'].astype(jnp.float32)
            self.norm_keys[e] = _normalize_rows(K)   # selection stays f32
            pf = self.params[f'e_p_{e}'].reshape(
                self.e_pool_size, self.e_p_length * self.emb_d)
            if self.prompt_cache_dtype is not None:
                pf = pf.astype(self.prompt_cache_dtype)
            self.p_flat[e] = pf

    def process_task_count(self):
        self.task_count += 1

    def forward(self, x_querry, l, x_block, train=False, task_id=None):
        loss = 0
        Ek = Ev = Gk = Gv = None

        e_valid = l in self.e_layers
        if e_valid:
            B = x_querry.shape[0]
            half = self.e_p_length // 2
            if train and self.task_id_bootstrap:
                # Live train path: tiny (B,D)x(D,) work -> plain jnp (a Pallas
                # launch costs more than the compute; XLA fuses this for free).
                qn = _normalize_rows(x_querry)
                k_task = self.norm_keys[l][task_id]
                cos = jnp.einsum('bd,d->b', qn, k_task,
                                 precision=jax.lax.Precision.HIGHEST)
                loss = jnp.sum(1.0 - cos)
                p = self.params[f'e_p_{l}']
                P_sel = jnp.broadcast_to(p[task_id][None],
                                         (B, self.e_p_length, self.emb_d))
            else:
                # TODO(synk): non-bootstrap train branch is dead code in this
                # config (task_id_bootstrap=True) and only supports top_k == 1.
                if train:
                    out_flat, loss = e_select(x_querry, self.norm_keys[l],
                                              self.p_flat[l], with_loss=True)
                else:
                    out_flat = e_select(x_querry, self.norm_keys[l],
                                        self.p_flat[l])
                P_sel = out_flat.reshape(B, self.e_p_length, self.emb_d)
            Ek = P_sel[:, :half, :].reshape(B, -1, self.emb_d)
            Ev = P_sel[:, half:, :].reshape(B, -1, self.emb_d)

        g_valid = l in self.g_layers
        if g_valid:
            B = x_querry.shape[0]
            j = self.g_p_length // 2
            g_p = self.params[f'g_p_{l}']
            # Zero-compute batch expansion: XLA's broadcast is lazy and fuses
            # downstream; a Pallas kernel here would be pure launch overhead.
            Gk = jnp.broadcast_to(g_p[None, :j, :], (B, j, self.emb_d))
            Gv = jnp.broadcast_to(g_p[None, j:, :],
                                  (B, self.g_p_length - j, self.emb_d))

        if e_valid and g_valid:
            p_return = [jnp.concatenate((Ek, Gk), axis=1),
                        jnp.concatenate((Ev, Gv), axis=1)]
        elif e_valid:
            p_return = [Ek, Ev]
        elif g_valid:
            p_return = [Gk, Gv]
            loss = 0
        else:
            p_return = None
            loss = 0

        if train:
            return p_return, loss, x_block
        return p_return, 0, x_block


# ----------------------------------------------------------------------------
if __name__ == "__main__":
    key = jax.random.PRNGKey(0)
    B, emb_d, key_d = 2, 32, 32
    prompt_param = [10, 8, 6]   # (e_pool_size, e_p_length, g_p_length)
    model = DualPromptPallas(emb_d, n_tasks=5, prompt_param=prompt_param,
                             key_dim=key_d, seed=0)

    k1, k2, k3 = jax.random.split(key, 3)
    x_querry = jax.random.normal(k1, (B, key_d), jnp.float32)
    x_block = jax.random.normal(k2, (B, 8, emb_d), jnp.float32)

    # e-layer, eval path (fused Pallas kernel)
    p_ret_e, loss_e, xb = model.forward(x_querry, 2, x_block, train=False)
    jax.block_until_ready(p_ret_e)

    # g-layer, eval path (plain broadcast, no kernel)
    p_ret_g, _, _ = model.forward(x_querry, 0, x_block, train=False)
    jax.block_until_ready(p_ret_g)

    # e-layer, train path with task-id bootstrap (live path, plain jnp loss)
    p_ret_t, loss_t, _ = model.forward(x_querry, 3, x_block, train=True,
                                       task_id=1)
    jax.block_until_ready((p_ret_t, loss_t))

    # ---------------- references (plain JAX, high-precision matmuls) --------
    HI = jax.lax.Precision.HIGHEST
    qn = x_querry / jnp.maximum(
        jnp.linalg.norm(x_querry, axis=1, keepdims=True), EPS)

    K = model.params['e_k_2']
    p2 = model.params['e_p_2']
    Kn = K / jnp.maximum(jnp.linalg.norm(K, axis=1, keepdims=True), EPS)
    cs = jnp.einsum('bj,kj->bk', qn, Kn, precision=HI)
    idx = jnp.argmax(cs, axis=1)
    half = prompt_param[1] // 2
    assert jnp.allclose(p_ret_e[0], p2[idx][:, :half, :], atol=1e-5)
    assert jnp.allclose(p_ret_e[1], p2[idx][:, half:, :], atol=1e-5)

    gp = model.params['g_p_0']
    j = prompt_param[2] // 2
    assert jnp.allclose(p_ret_g[0], jnp.broadcast_to(gp[None, :j, :],
                                                     (B, j, emb_d)))
    assert jnp.allclose(p_ret_g[1], jnp.broadcast_to(gp[None, j:, :],
                                                     (B, j, emb_d)))

    K3 = model.params['e_k_3']
    p3 = model.params['e_p_3']
    Kn3 = K3 / jnp.maximum(jnp.linalg.norm(K3, axis=1, keepdims=True), EPS)
    cs3 = jnp.einsum('bj,kj->bk', qn, Kn3, precision=HI)
    assert jnp.allclose(loss_t, jnp.sum(1.0 - cs3[:, 1]), atol=1e-4)
    assert jnp.allclose(p_ret_t[0],
                        jnp.broadcast_to(p3[1][None, :half, :], (B, half, emb_d)))
    assert jnp.allclose(p_ret_t[1],
                        jnp.broadcast_to(p3[1][None, half:, :], (B, half, emb_d)))

    # Ragged / multi-tile batch: exercises cdiv tiling (>=2 grid steps), the
    # with_loss colsum/count accumulator, and padded-row masking.
    B2 = 20
    xq20 = jax.random.normal(k3, (B2, key_d), jnp.float32)
    out20 = e_select(xq20, model.norm_keys[2], model.p_flat[2])
    out20_l, loss20 = e_select(xq20, model.norm_keys[2], model.p_flat[2],
                               with_loss=True)
    jax.block_until_ready((out20, out20_l, loss20))
    qn20 = xq20 / jnp.maximum(jnp.linalg.norm(xq20, axis=1, keepdims=True), EPS)
    cs20 = jnp.einsum('bj,kj->bk', qn20, Kn, precision=HI)
    idx20 = jnp.argmax(cs20, axis=1)
    ref20 = p2[idx20].reshape(B2, -1)
    assert jnp.allclose(out20, ref20, atol=1e-5)
    assert jnp.allclose(out20_l, ref20, atol=1e-5)
    loss20_ref = jnp.sum(1.0 - cs20[:, idx20])   # torch broadcast fancy index
    assert jnp.allclose(loss20, loss20_ref, atol=1e-2)

    # bf16 prompt-cache / output variant (halves the dominant HBM write);
    # key/argmax selection stays f32 and bit-stable.
    model_bf16 = DualPromptPallas(emb_d, n_tasks=5, prompt_param=prompt_param,
                                  key_dim=key_d, seed=0,
                                  prompt_cache_dtype=jnp.bfloat16)
    out_bf = e_select(x_querry, model_bf16.norm_keys[2], model_bf16.p_flat[2])
    jax.block_until_ready(out_bf)
    assert out_bf.dtype == jnp.bfloat16
    assert jnp.allclose(
        out_bf.astype(jnp.float32).reshape(B, prompt_param[1], emb_d),
        p2[idx].astype(jnp.bfloat16).astype(jnp.float32), atol=1e-2)

    print("KERNEL_OK")
</pallas_src>

<mosaic_0001>
module attributes {stable_mosaic.version = 11 : i64} {
  func.func @_e_select_kernel(%arg0: i32, %arg1: i32, %arg2: memref<2x32xf32, #tpu.memory_space<vmem>>, %arg3: memref<10x32xf32, #tpu.memory_space<vmem>>, %arg4: memref<10x256xf32, #tpu.memory_space<vmem>>, %arg5: memref<2x256xf32, #tpu.memory_space<vmem>>) attributes {dimension_semantics = [#tpu.dimension_semantics<parallel>, #tpu.dimension_semantics<parallel>], iteration_bounds = array<i64: 1, 1>, scalar_prefetch = 0 : i64, scratch_operands = 0 : i64, tpu.core_type = #tpu.core_type<tc>, window_params = [{transform_indices = @transform_0, window_bounds = array<i64: 2, 32>}, {pipeline_mode = #tpu.pipeline_mode<synchronous>, transform_indices = @transform_1, window_bounds = array<i64: 10, 32>}, {pipeline_mode = #tpu.pipeline_mode<synchronous>, transform_indices = @transform_2, window_bounds = array<i64: 10, 256>}, {transform_indices = @transform_3, window_bounds = array<i64: 2, 256>}]} {
    %c0 = arith.constant 0 : index
    %c0_0 = arith.constant 0 : index
    %0 = vector.load %arg2[%c0, %c0_0] : memref<2x32xf32, #tpu.memory_space<vmem>>, vector<2x32xf32>
    %1 = arith.mulf %0, %0 : vector<2x32xf32>
    %cst = arith.constant dense<0.000000e+00> : vector<2xf32>
    %2 = vector.multi_reduction <add>, %1, %cst [1] : vector<2x32xf32> to vector<2xf32>
    %3 = vector.shape_cast %2 : vector<2xf32> to vector<2x1xf32>
    %cst_1 = arith.constant 1.000000e-24 : f32
    %4 = vector.broadcast %cst_1 : f32 to vector<2x1xf32>
    %5 = arith.maximumf %3, %4 : vector<2x1xf32>
    %6 = math.rsqrt %5 : vector<2x1xf32>
    %7 = vector.broadcast %6 : vector<2x1xf32> to vector<2x32xf32>
    %8 = arith.mulf %0, %7 : vector<2x32xf32>
    %c0_2 = arith.constant 0 : index
    %c0_3 = arith.constant 0 : index
    %9 = vector.load %arg3[%c0_2, %c0_3] : memref<10x32xf32, #tpu.memory_space<vmem>>, vector<10x32xf32>
    %cst_4 = arith.constant dense<0.000000e+00> : vector<2x10xf32>
    %10 = tpu.matmul %8, %9, %cst_4 {dimension_numbers = #tpu.dot_dimension_numbers<[1], [1], [0], [0], [0, 0, 1, 0], [], []>} : vector<2x32xf32>, vector<10x32xf32>, vector<2x10xf32> -> vector<2x10xf32>
    %c0_5 = arith.constant 0 : index
    %c0_6 = arith.constant 0 : index
    %11 = vector.load %arg4[%c0_5, %c0_6] : memref<10x256xf32, #tpu.memory_space<vmem>>, vector<10x256xf32>
    %12 = tpu.iota {dimensions = array<i32: 1>} : vector<2x10xi32>
    %cst_7 = arith.constant dense<0xFF800000> : vector<2xf32>
    %13 = vector.multi_reduction <maximumf>, %10, %cst_7 [1] : vector<2x10xf32> to vector<2xf32>
    %14 = vector.shape_cast %13 : vector<2xf32> to vector<2x1xf32>
    %15 = vector.broadcast %14 : vector<2x1xf32> to vector<2x10xf32>
    %16 = arith.cmpf oge, %10, %15 : vector<2x10xf32>
    %c10_i32 = arith.constant 10 : i32
    %17 = vector.broadcast %c10_i32 : i32 to vector<2x10xi32>
    %18 = arith.select %16, %12, %17 : vector<2x10xi1>, vector<2x10xi32>
    %cst_8 = arith.constant dense<2147483647> : vector<2xi32>
    %19 = vector.multi_reduction <minsi>, %18, %cst_8 [1] : vector<2x10xi32> to vector<2xi32>
    %20 = vector.shape_cast %19 : vector<2xi32> to vector<2x1xi32>
    %21 = vector.broadcast %20 : vector<2x1xi32> to vector<2x10xi32>
    %22 = arith.cmpi eq, %12, %21 : vector<2x10xi32>
    %23 = arith.extui %22 : vector<2x10xi1> to vector<2x10xi32>
    %24 = arith.sitofp %23 : vector<2x10xi32> to vector<2x10xf32>
    %cst_9 = arith.constant dense<0.000000e+00> : vector<2x256xf32>
    %25 = tpu.matmul %24, %11, %cst_9 {dimension_numbers = #tpu.dot_dimension_numbers<[1], [0], [0], [1], [0, 0, 1, 1], [], []>} : vector<2x10xf32>, vector<10x256xf32>, vector<2x256xf32> -> vector<2x256xf32>
    %c0_10 = arith.constant 0 : index
    %c0_11 = arith.constant 0 : index
    %26 = vector.load %arg5[%c0_10, %c0_11] : memref<2x256xf32, #tpu.memory_space<vmem>>, vector<2x256xf32>
    tpu.vector_store %arg5[%c0_10, %c0_11], %25 {strides = array<i32>} : memref<2x256xf32, #tpu.memory_space<vmem>>, vector<2x256xf32>,
    return
  }
  func.func @transform_0(%arg0: i32, %arg1: i32) -> (i32, i32) {
    %c0_i32 = arith.constant 0 : i32
    %c0_i32_0 = arith.constant 0 : i32
    return %arg0, %c0_i32 : i32, i32
  }
  func.func @transform_1(%arg0: i32, %arg1: i32) -> (i32, i32) {
    %c0_i32 = arith.constant 0 : i32
    %c0_i32_0 = arith.constant 0 : i32
    %c0_i32_1 = arith.constant 0 : i32
    return %c0_i32, %c0_i32_0 : i32, i32
  }
  func.func @transform_2(%arg0: i32, %arg1: i32) -> (i32, i32) {
    %c0_i32 = arith.constant 0 : i32
    %c0_i32_0 = arith.constant 0 : i32
    return %c0_i32, %arg1 : i32, i32
  }
  func.func @transform_3(%arg0: i32, %arg1: i32) -> (i32, i32) {
    %c0_i32 = arith.constant 0 : i32
    return %arg0, %arg1 : i32, i32
  }
}

module attributes {stable_mosaic.version = 11 : i64} {
  func.func @_e_select_kernel(%arg0: i32, %arg1: i32, %arg2: memref<2x32xf32, #tpu.memory_space<vmem>>, %arg3: memref<10x32xf32, #tpu.memory_space<vmem>>, %arg4: memref<10x256xf32, #tpu.memory_space<vmem>>, %arg5: memref<2x256xf32, #tpu.memory_space<vmem>>) attributes {dimension_semantics = [#tpu.dimension_semantics<parallel>, #tpu.dimension_semantics<parallel>], iteration_bounds = array<i64: 1, 1>, scalar_prefetch = 0 : i64, scratch_operands = 0 : i64, tpu.core_type = #tpu.core_type<tc>, window_params = [{transform_indices = @transform_0, window_bounds = array<i64: 2, 32>}, {pipeline_mode = #tpu.pipeline_mode<synchronous>, transform_indices = @transform_1, window_bounds = array<i64: 10, 32>}, {transform_indices = @transform_2, window_bounds = array<i64: 10, 256>}, {transform_indices = @transform_3, window_bounds = array<i64: 2, 256>}]} {
    %c0 = arith.constant 0 : index
    %c0_0 = arith.constant 0 : index
    %0 = vector.load %arg2[%c0, %c0_0] : memref<2x32xf32, #tpu.memory_space<vmem>>, vector<2x32xf32>
    %1 = arith.mulf %0, %0 : vector<2x32xf32>
    %cst = arith.constant dense<0.000000e+00> : vector<2xf32>
    %2 = vector.multi_reduction <add>, %1, %cst [1] : vector<2x32xf32> to vector<2xf32>
    %3 = vector.shape_cast %2 : vector<2xf32> to vector<2x1xf32>
    %cst_1 = arith.constant 1.000000e-24 : f32
    %4 = vector.broadcast %cst_1 : f32 to vector<2x1xf32>
    %5 = arith.maximumf %3, %4 : vector<2x1xf32>
    %6 = math.rsqrt %5 : vector<2x1xf32>
    %7 = vector.broadcast %6 : vector<2x1xf32> to vector<2x32xf32>
    %8 = arith.mulf %0, %7 : vector<2x32xf32>
    %c0_2 = arith.constant 0 : index
    %c0_3 = arith.constant 0 : index
    %9 = vector.load %arg3[%c0_2, %c0_3] : memref<10x32xf32, #tpu.memory_space<vmem>>, vector<10x32xf32>
    %cst_4 = arith.constant dense<0.000000e+00> : vector<2x10xf32>
    %10 = tpu.matmul %8, %9, %cst_4 {dimension_numbers = #tpu.dot_dimension_numbers<[1], [1], [0], [0], [0, 0, 1, 0], [], []>} : vector<2x32xf32>, vector<10x32xf32>, vector<2x10xf32> -> vector<2x10xf32>
    %c0_5 = arith.constant 0 : index
    %c0_6 = arith.constant 0 : index
    %11 = vector.load %arg4[%c0_5, %c0_6] : memref<10x256xf32, #tpu.memory_space<vmem>>, vector<10x256xf32>
    %12 = tpu.iota {dimensions = array<i32: 1>} : vector<2x10xi32>
    %cst_7 = arith.constant dense<0xFF800000> : vector<2xf32>
    %13 = vector.multi_reduction <maximumf>, %10, %cst_7 [1] : vector<2x10xf32> to vector<2xf32>
    %14 = vector.shape_cast %13 : vector<2xf32> to vector<2x1xf32>
    %15 = vector.broadcast %14 : vector<2x1xf32> to vector<2x10xf32>
    %16 = arith.cmpf oge, %10, %15 : vector<2x10xf32>
    %c10_i32 = arith.constant 10 : i32
    %17 = vector.broadcast %c10_i32 : i32 to vector<2x10xi32>
    %18 = arith.select %16, %12, %17 : vector<2x10xi1>, vector<2x10xi32>
    %cst_8 = arith.constant dense<2147483647> : vector<2xi32>
    %19 = vector.multi_reduction <minsi>, %18, %cst_8 [1] : vector<2x10xi32> to vector<2xi32>
    %20 = vector.shape_cast %19 : vector<2xi32> to vector<2x1xi32>
    %21 = vector.broadcast %20 : vector<2x1xi32> to vector<2x10xi32>
    %22 = arith.cmpi eq, %12, %21 : vector<2x10xi32>
    %23 = arith.extui %22 : vector<2x10xi1> to vector<2x10xi32>
    %24 = arith.sitofp %23 : vector<2x10xi32> to vector<2x10xf32>
    %cst_9 = arith.constant dense<0.000000e+00> : vector<2x256xf32>
    %25 = tpu.matmul %24, %11, %cst_9 {dimension_numbers = #tpu.dot_dimension_numbers<[1], [0], [0], [1], [0, 0, 1, 1], [], []>} : vector<2x10xf32>, vector<10x256xf32>, vector<2x256xf32> -> vector<2x256xf32>
    %c0_10 = arith.constant 0 : index
    %c0_11 = arith.constant 0 : index
    %26 = vector.load %arg5[%c0_10, %c0_11] : memref<2x256xf32, #tpu.memory_space<vmem>>, vector<2x256xf32>
    tpu.vector_store %arg5[%c0_10, %c0_11], %25 {strides = array<i32>} : memref<2x256xf32, #tpu.memory_space<vmem>>, vector<2x256xf32>,
    return
  }
  func.func @transform_0(%arg0: i32, %arg1: i32) -> (i32, i32) {
    %c0_i32 = arith.constant 0 : i32
    %c0_i32_0 = arith.constant 0 : i32
    return %arg0, %c0_i32 : i32, i32
  }
  func.func @transform_1(%arg0: i32, %arg1: i32) -> (i32, i32) {
    %c0_i32 = arith.constant 0 : i32
    %c0_i32_0 = arith.constant 0 : i32
    %c0_i32_1 = arith.constant 0 : i32
    return %c0_i32, %c0_i32_0 : i32, i32
  }
  func.func @transform_2(%arg0: i32, %arg1: i32) -> (i32, i32) {
    %c0_i32 = arith.constant 0 : i32
    %c0_i32_0 = arith.constant 0 : i32
    return %c0_i32, %arg1 : i32, i32
  }
  func.func @transform_3(%arg0: i32, %arg1: i32) -> (i32, i32) {
    %c0_i32 = arith.constant 0 : i32
    return %arg0, %arg1 : i32, i32
  }
}

</mosaic_0001>

<bundles_post_ra>
// kernel: tpu_custom_call.1
= control target key start
LH: loop header
LB: loop body
LE: loop exit
PB: predicated region body
PF: predicated region fallthrough
CT: control target
= control target key end

     0   :  { %8 = vsyncpa [#allocation3], 0  ;;  %s383_s0 = inlined_call_operand.hbm [shape: f32[2,32], index: 0, kind: input, shape index: {}]   ;;  %s384_s1 = inlined_call_operand.hbm [shape: f32[10,32], index: 1, kind: input, shape index: {}]   ;;  %s385_s2 = inlined_call_operand.hbm [shape: f32[10,256], index: 2, kind: input, shape index: {}]   ;;  %s386_s3 = inlined_call_operand.hbm [shape: f32[2,256], index: 3, kind: output, shape index: {}]  }
   0x1   :  { %9 = vsyncpa [#allocation6], 0  ;;  %s26_s14 = sshll.u32 %s384_s1, 4  ;;  %s27_s14 = int_to_ptr.hbm [resolvable:$true] %s26_s14 }
   0x2   :  { %10 = vsyncpa [#allocation4], 0  ;;  %s336_s15 = smov [#allocation5]   ;;  %s16_s19 = sshll.u32 %s383_s0, 4  ;;  %s17_s19 = int_to_ptr.hbm [resolvable:$true] %s16_s19 }
   0x3   :  { %s28_s16 = sshll.u32 %s336_s15, 4  ;;  %s337_s20 = smov 128   ;;  %s29_s16 = int_to_ptr.vmem [resolvable:$true] %s28_s16 }
   0x4   :  { %s338_s21 = smov 8   ;;  %s339_s22 = smov [#allocation2]  }
   0x5   :  { %34 = dma.hbm_to_vmem [thread:$0]  %s27_s14, 256, %s29_s16, [#allocation6], %s337_s20, %s337_s20, %s338_s21  }
   0x6   :  { %s18_s23 = sshll.u32 %s339_s22, 4  ;;  %s39_s26 = sshll.u32 %s385_s2, 4  ;;  %s19_s23 = int_to_ptr.vmem [resolvable:$true] %s18_s23  ;;  %s40_s26 = int_to_ptr.hbm [resolvable:$true] %s39_s26 }
   0x7   :  { %21 = dma.hbm_to_vmem [thread:$0]  %s17_s19, 32, %s19_s23, [#allocation3]  }
   0x8   :  { %s340_s1 = smov [#allocation7]   ;;  %s341_s28 = smov 256  }
   0x9   :  { %s41_s27 = sshll.u32 %s340_s1, 4  ;;  %s342_s29 = smov 16   ;;  %s42_s27 = int_to_ptr.vmem [resolvable:$true] %s41_s27 }
   0xa   :  { %47 = dma.hbm_to_vmem [thread:$0]  %s40_s26, 512, %s42_s27, [#allocation6], %s341_s28, %s341_s28, %s342_s29  }
   0xb   :  { %330 = dma.done.wait [#allocation3], 32  }
   0xc   :  { %331 = vsyncadd [#allocation3], 4294967264 }
   0xd   :  { %332 = dma.done.wait [#allocation6], 768  }
   0xe   :  { %333 = vsyncadd [#allocation6], 4294966528  ;;  %v60_v0 = vld [vmem:[#allocation2] sm:$0x3]  ;;  %vm62_vm0 = vcmask 254976   ;;  %vm80_vm1 = vcmask 261120   ;;  %v114_v17 = vlaneseq }
   0xf   :  { %v61_v1 = vmul.f32 %v60_v0, %v60_v0  ;;  %v79_v3 = vld [vmem:[#allocation5 + $0x8] sm:$0x3]  ;;  %v78_v4 = vld [vmem:[#allocation5] sm:$0xff]  ;;  %vm116_vm5 = vcmask 74752   ;;  %vm144_vm8 = vcmask 1041408   ;;  %v110_v30 = vld [vmem:[#allocation7] sm:$0xff] }
  0x10   :  { %215 = vmatpush.xpose.msk.msra.mxu0 %vm80_vm1, %v79_v3  ;;  %v115_v18 = vand.u32 127, %v114_v17  ;;  %v112_v28 = vld [vmem:[#allocation7 + $0x10] sm:$0x3]  ;;  %v113_v29 = vld [vmem:[#allocation7 + $0x18] sm:$0x3]  ;;  %v111_v31 = vld [vmem:[#allocation7 + $0x8] sm:$0xff] }
  0x11   :  { %v63_v2 = vsel %vm62_vm0, %v61_v1, 0.0  ;;  %219 = vmatpush.msk.msra.mxu1 %vm144_vm8, %v112_v28  ;;  %221 = vmatpush.msk.msra.mxu2 %vm144_vm8, %v113_v29  ;;  %vm140_vm9 = vcmask 80896   ;;  %v343_v37 = vmov 0.0   ;;  %s344_s0 = smov [#allocation8]   ;;  %s204_s5 = sshll.u32 %s386_s3, 4  ;;  %s205_s5 = int_to_ptr.hbm [resolvable:$true] %s204_s5 }
  0x12   :  { %64 = vadd.xlane.f32.xlu0 %v63_v2  ;;  %s202_s2 = sshll.u32 %s344_s0, 4  ;;  %s203_s2 = int_to_ptr.vmem [resolvable:$true] %s202_s2 }
  0x13   :  { %166 = vmatpush.msra.mxu1 %v110_v30  ;;  %186 = vmatpush.msra.mxu2 %v111_v31 }
  0x14   :  { %216 = vmatpush.xpose.msk.msra.mxu0 %vm80_vm1, %v78_v4 }
  0x85   :  { %v65_v5 = vpop.xlane.xlu0 %64 }
  0x86   :  { %v66_v6 = vmax.f32 %v65_v5, 1e-24 }
  0x88   :  { %232 = vrsqrt.f32 %v66_v6  ;;  %vm73_vm3 = vweird.f32 %v66_v6 }
  0x8e   :  { %v233_v7 = vpop.eup %232 }
  0x8f   :  { %v68_v8 = vmul.f32 %v233_v7, %v66_v6  ;;  %vm74_vm2 = vweird.f32 %v233_v7 }
  0x90   :  { %vm75_vm4 = vmor %vm73_vm3, %vm74_vm2 }
  0x91   :  { %v69_v9 = vmul.f32 %v233_v7, %v68_v8 }
  0x93   :  { %v70_v10 = vmul.f32 0.5, %v69_v9 }
  0x95   :  { %v71_v11 = vsub.f32 1.5, %v70_v10 }
  0x97   :  { %v72_v12 = vmul.f32 %v233_v7, %v71_v11 }
  0x99   :  { %v76_v13 = vsel %vm75_vm4, %v233_v7, %v72_v12 }
  0x9a   :  { %v77_v14 = vmul.f32 %v76_v13, %v60_v0 }
  0x9c   :  { %217 = vmatmul.msk.f32.vlgmr.msra.gmra.mxu0 %vm80_vm1, %v77_v14 }
 0x119   :  { %v107_v15 = vpop.f32.mrf.mxu0 }
 0x11a   :  { %v117_v16 = vsel %vm116_vm5, %v107_v15, -inf }
 0x11b   :  { %118 = vmax.xlane.f32.xlu0 %v117_v16 }
 0x18e   :  { %v119_v19 = vpop.xlane.xlu0 %118 }
 0x18f   :  { %vm120_vm6 = vcmp.ge.f32.partialorder %v107_v15, %v119_v19 }
 0x190   :  { %v121_v20 = vsel %vm120_vm6, %v115_v18, 10 }
 0x191   :  { %v122_v21 = vsel %vm116_vm5, %v121_v20, 2147483647 }
 0x192   :  { %v124_v22 = vshra.s32 %v122_v21, 16  ;;  %v123_v24 = vand.u32 65535, %v122_v21 }
 0x194   :  { %v126_v23 = vcvt.s32.f32 %v124_v22  ;;  %v125_v26 = vcvt.s32.f32 %v123_v24 }
 0x196   :  { %127 = vmin.xlane.f32.xlu1 %v126_v23 }
 0x209   :  { %v128_v25 = vpop.xlane.xlu1 %127 }
 0x20a   :  { %vm129_vm7 = vcmp.eq.f32.partialorder %v126_v23, %v128_v25  ;;  %v134_v32 = vcvt.f32.s32 %v128_v25 }
 0x20b   :  { %v130_v27 = vsel %vm129_vm7, %v125_v26, inf }
 0x20c   :  { %131 = vmin.xlane.f32.xlu1 %v130_v27  ;;  %v135_v34 = vshll.u32 %v134_v32, 16 }
 0x27f   :  { %v132_v33 = vpop.xlane.xlu1 %131 }
 0x280   :  { %v133_v35 = vcvt.f32.s32 %v132_v33 }
 0x282   :  { %v136_v36 = vadd.s32 %v135_v34, %v133_v35 }
 0x284   :  { %vm137_vm10 = vcmp.eq.s32.totalorder %v115_v18, %v136_v36 }
 0x285   :  { %v218_v38 = vsel %vm137_vm10, 1.0, %v343_v37 }
 0x286   :  { %220 = vmatmul.msk.f32.vlgmr.msra.gmra.mxu1 %vm140_vm9, %v218_v38  ;;  %222 = vmatmul.msk.f32.vlgmr.msra.gmra.mxu2 %vm140_vm9, %v218_v38 }
 0x303   :  { %v168_v41 = vpop.f32.mrf.mxu1 }
 0x309   :  { %v188_v39 = vpop.f32.mrf.mxu2 }
 0x30a   :  { %v193_v40 = vrot.slane %v188_v39, 6 }
 0x30c   :  { %v194_v42 = vsel %vm144_vm8, %v168_v41, %v193_v40 }
 0x30d   :  { %196 = vst [vmem:[#allocation8] sm:$0xf] %v194_v42 }
 0x30e   :  { %207 = dma.vmem_to_hbm [thread:$0]  %s203_s2, 64, %s205_s5, [#allocation4]  }
 0x30f   :  { %334 = dma.done.wait [#allocation4], 64  }
 0x310   :  { %335 = vsyncadd [#allocation4], 4294967232 }
 0x311   :  { %212 = vsyncpa [#allocation3], 1 }
 0x312   :  { %213 = vsyncpa [#allocation6], 1 }
 0x313   :  { %214 = vsyncpa [#allocation4], 1 }

// kernel: tpu_custom_call.1
= control target key start
LH: loop header
LB: loop body
LE: loop exit
PB: predicated region body
PF: predicated region fallthrough
CT: control target
= control target key end

     0   :  { %8 = vsyncpa [#allocation3], 0  ;;  %s383_s0 = inlined_call_operand.hbm [shape: f32[2,32], index: 0, kind: input, shape index: {}]   ;;  %s384_s1 = inlined_call_operand.hbm [shape: f32[10,32], index: 1, kind: input, shape index: {}]   ;;  %s385_s2 = inlined_call_operand.hbm [shape: f32[10,256], index: 2, kind: input, shape index: {}]   ;;  %s386_s3 = inlined_call_operand.hbm [shape: f32[2,256], index: 3, kind: output, shape index: {}]  }
   0x1   :  { %9 = vsyncpa [#allocation6], 0  ;;  %s26_s14 = sshll.u32 %s384_s1, 4  ;;  %s27_s14 = int_to_ptr.hbm [resolvable:$true] %s26_s14 }
   0x2   :  { %10 = vsyncpa [#allocation4], 0  ;;  %s336_s15 = smov [#allocation5]   ;;  %s16_s19 = sshll.u32 %s383_s0, 4  ;;  %s17_s19 = int_to_ptr.hbm [resolvable:$true] %s16_s19 }
   0x3   :  { %s28_s16 = sshll.u32 %s336_s15, 4  ;;  %s337_s20 = smov 128   ;;  %s29_s16 = int_to_ptr.vmem [resolvable:$true] %s28_s16 }
   0x4   :  { %s338_s21 = smov 8   ;;  %s339_s22 = smov [#allocation2]  }
   0x5   :  { %34 = dma.hbm_to_vmem [thread:$0]  %s27_s14, 256, %s29_s16, [#allocation6], %s337_s20, %s337_s20, %s338_s21  }
   0x6   :  { %s18_s23 = sshll.u32 %s339_s22, 4  ;;  %s39_s26 = sshll.u32 %s385_s2, 4  ;;  %s19_s23 = int_to_ptr.vmem [resolvable:$true] %s18_s23  ;;  %s40_s26 = int_to_ptr.hbm [resolvable:$true] %s39_s26 }
   0x7   :  { %21 = dma.hbm_to_vmem [thread:$0]  %s17_s19, 32, %s19_s23, [#allocation3]  }
   0x8   :  { %s340_s1 = smov [#allocation7]   ;;  %s341_s28 = smov 256  }
   0x9   :  { %s41_s27 = sshll.u32 %s340_s1, 4  ;;  %s342_s29 = smov 16   ;;  %s42_s27 = int_to_ptr.vmem [resolvable:$true] %s41_s27 }
   0xa   :  { %47 = dma.hbm_to_vmem [thread:$0]  %s40_s26, 512, %s42_s27, [#allocation6], %s341_s28, %s341_s28, %s342_s29  }
   0xb   :  { %330 = dma.done.wait [#allocation3], 32  }
   0xc   :  { %331 = vsyncadd [#allocation3], 4294967264 }
   0xd   :  { %332 = dma.done.wait [#allocation6], 768  }
   0xe   :  { %333 = vsyncadd [#allocation6], 4294966528  ;;  %v60_v0 = vld [vmem:[#allocation2] sm:$0x3]  ;;  %vm62_vm0 = vcmask 254976   ;;  %vm80_vm1 = vcmask 261120   ;;  %v114_v17 = vlaneseq }
   0xf   :  { %v61_v1 = vmul.f32 %v60_v0, %v60_v0  ;;  %v79_v3 = vld [vmem:[#allocation5 + $0x8] sm:$0x3]  ;;  %v78_v4 = vld [vmem:[#allocation5] sm:$0xff]  ;;  %vm116_vm5 = vcmask 74752   ;;  %vm144_vm8 = vcmask 1041408   ;;  %v110_v30 = vld [vmem:[#allocation7] sm:$0xff] }
  0x10   :  { %215 = vmatpush.xpose.msk.msra.mxu0 %vm80_vm1, %v79_v3  ;;  %v115_v18 = vand.u32 127, %v114_v17  ;;  %v112_v28 = vld [vmem:[#allocation7 + $0x10] sm:$0x3]  ;;  %v113_v29 = vld [vmem:[#allocation7 + $0x18] sm:$0x3]  ;;  %v111_v31 = vld [vmem:[#allocation7 + $0x8] sm:$0xff] }
  0x11   :  { %v63_v2 = vsel %vm62_vm0, %v61_v1, 0.0  ;;  %219 = vmatpush.msk.msra.mxu1 %vm144_vm8, %v112_v28  ;;  %221 = vmatpush.msk.msra.mxu2 %vm144_vm8, %v113_v29  ;;  %vm140_vm9 = vcmask 80896   ;;  %v343_v37 = vmov 0.0   ;;  %s344_s0 = smov [#allocation8]   ;;  %s204_s5 = sshll.u32 %s386_s3, 4  ;;  %s205_s5 = int_to_ptr.hbm [resolvable:$true] %s204_s5 }
  0x12   :  { %64 = vadd.xlane.f32.xlu0 %v63_v2  ;;  %s202_s2 = sshll.u32 %s344_s0, 4  ;;  %s203_s2 = int_to_ptr.vmem [resolvable:$true] %s202_s2 }
  0x13   :  { %166 = vmatpush.msra.mxu1 %v110_v30  ;;  %186 = vmatpush.msra.mxu2 %v111_v31 }
  0x14   :  { %216 = vmatpush.xpose.msk.msra.mxu0 %vm80_vm1, %v78_v4 }
  0x85   :  { %v65_v5 = vpop.xlane.xlu0 %64 }
  0x86   :  { %v66_v6 = vmax.f32 %v65_v5, 1e-24 }
  0x88   :  { %232 = vrsqrt.f32 %v66_v6  ;;  %vm73_vm3 = vweird.f32 %v66_v6 }
  0x8e   :  { %v233_v7 = vpop.eup %232 }
  0x8f   :  { %v68_v8 = vmul.f32 %v233_v7, %v66_v6  ;;  %vm74_vm2 = vweird.f32 %v233_v7 }
  0x90   :  { %vm75_vm4 = vmor %vm73_vm3, %vm74_vm2 }
  0x91   :  { %v69_v9 = vmul.f32 %v233_v7, %v68_v8 }
  0x93   :  { %v70_v10 = vmul.f32 0.5, %v69_v9 }
  0x95   :  { %v71_v11 = vsub.f32 1.5, %v70_v10 }
  0x97   :  { %v72_v12 = vmul.f32 %v233_v7, %v71_v11 }
  0x99   :  { %v76_v13 = vsel %vm75_vm4, %v233_v7, %v72_v12 }
  0x9a   :  { %v77_v14 = vmul.f32 %v76_v13, %v60_v0 }
  0x9c   :  { %217 = vmatmul.msk.f32.vlgmr.msra.gmra.mxu0 %vm80_vm1, %v77_v14 }
 0x119   :  { %v107_v15 = vpop.f32.mrf.mxu0 }
 0x11a   :  { %v117_v16 = vsel %vm116_vm5, %v107_v15, -inf }
 0x11b   :  { %118 = vmax.xlane.f32.xlu0 %v117_v16 }
 0x18e   :  { %v119_v19 = vpop.xlane.xlu0 %118 }
 0x18f   :  { %vm120_vm6 = vcmp.ge.f32.partialorder %v107_v15, %v119_v19 }
 0x190   :  { %v121_v20 = vsel %vm120_vm6, %v115_v18, 10 }
 0x191   :  { %v122_v21 = vsel %vm116_vm5, %v121_v20, 2147483647 }
 0x192   :  { %v124_v22 = vshra.s32 %v122_v21, 16  ;;  %v123_v24 = vand.u32 65535, %v122_v21 }
 0x194   :  { %v126_v23 = vcvt.s32.f32 %v124_v22  ;;  %v125_v26 = vcvt.s32.f32 %v123_v24 }
 0x196   :  { %127 = vmin.xlane.f32.xlu1 %v126_v23 }
 0x209   :  { %v128_v25 = vpop.xlane.xlu1 %127 }
 0x20a   :  { %vm129_vm7 = vcmp.eq.f32.partialorder %v126_v23, %v128_v25  ;;  %v134_v32 = vcvt.f32.s32 %v128_v25 }
 0x20b   :  { %v130_v27 = vsel %vm129_vm7, %v125_v26, inf }
 0x20c   :  { %131 = vmin.xlane.f32.xlu1 %v130_v27  ;;  %v135_v34 = vshll.u32 %v134_v32, 16 }
 0x27f   :  { %v132_v33 = vpop.xlane.xlu1 %131 }
 0x280   :  { %v133_v35 = vcvt.f32.s32 %v132_v33 }
 0x282   :  { %v136_v36 = vadd.s32 %v135_v34, %v133_v35 }
 0x284   :  { %vm137_vm10 = vcmp.eq.s32.totalorder %v115_v18, %v136_v36 }
 0x285   :  { %v218_v38 = vsel %vm137_vm10, 1.0, %v343_v37 }
 0x286   :  { %220 = vmatmul.msk.f32.vlgmr.msra.gmra.mxu1 %vm140_vm9, %v218_v38  ;;  %222 = vmatmul.msk.f32.vlgmr.msra.gmra.mxu2 %vm140_vm9, %v218_v38 }
 0x303   :  { %v168_v41 = vpop.f32.mrf.mxu1 }
 0x309   :  { %v188_v39 = vpop.f32.mrf.mxu2 }
 0x30a   :  { %v193_v40 = vrot.slane %v188_v39, 6 }
 0x30c   :  { %v194_v42 = vsel %vm144_vm8, %v168_v41, %v193_v40 }
 0x30d   :  { %196 = vst [vmem:[#allocation8] sm:$0xf] %v194_v42 }
 0x30e   :  { %207 = dma.vmem_to_hbm [thread:$0]  %s203_s2, 64, %s205_s5, [#allocation4]  }
 0x30f   :  { %334 = dma.done.wait [#allocation4], 64  }
 0x310   :  { %335 = vsyncadd [#allocation4], 4294967232 }
 0x311   :  { %212 = vsyncpa [#allocation3], 1 }
 0x312   :  { %213 = vsyncpa [#allocation6], 1 }
 0x313   :  { %214 = vsyncpa [#allocation4], 1 }

</bundles_post_ra>
